<compile_context>
chip_gen: v6e
topology: v6e:2x2x1
jax: 0.10.0
libtpu: 0.0.40
codegen_flags: <defaults>
</compile_context>

<pallas_src>
import functools

import jax
import jax.numpy as jnp
from jax.experimental import pallas as pl
from jax.experimental.pallas import tpu as pltpu


HIDDEN1 = 8
HIDDEN2 = 4
CODE_DIM = HIDDEN1 + HIDDEN2

_LANE = 128
_VMEM_LIMIT = 32 * 1024 * 1024        # scoped VMEM request (safe on v5e/v6e/v7x)
_VMEM_WORK_BUDGET = 24 * 1024 * 1024  # budget used to derive the batch tile
_MAX_BATCH_TILE = 4096
_GRIDLESS_MAX_BATCH = 256             # below this, skip the grid/pipeline machinery


def _round_up(n, m):
    return ((n + m - 1) // m) * m


# ---------------------------------------------------------------------------
# Kernel
# ---------------------------------------------------------------------------
def _salmon_kernel(x_ref, slab_ref, out_ref, *, d_total, r1, r2):
    """Fused SALMON forward for one batch tile.

    slab layout (rows):
      [0 : d_total)        W_big   -- zero-padded [W1 | W2 | Wc_rest] block
      [r1 : r1 + C)        Wc_code -- zero-padded code-rows of classifier W
      [r2 : r2 + 1)        bias    -- [b1 | b2 | bc | 0...]
    where C = out_ref.shape[-1] is the (possibly lane-padded) output width.
    """
    C = out_ref.shape[-1]
    x = x_ref[...]                                     # [tm, d_total] (f32 or bf16)

    w_big = slab_ref[0:d_total, :]                     # [d_total, C], same dtype as x
    wc_code = slab_ref[r1:r1 + C, :].astype(jnp.float32)   # [C, C]
    bias = slab_ref[r2:r2 + 1, :].astype(jnp.float32)      # [1, C]

    # h[:, :12] = encoder pre-activations, h[:, 12:] = x_rest @ Wc3 + bc
    h = jnp.dot(x, w_big, preferred_element_type=jnp.float32) + bias
    s = jax.nn.sigmoid(h)                              # s[:, :12] == code (f32)

    # s @ wc_code is zero in the first 12 lanes and code @ Wc12 in the label
    # lanes, so one full-width store yields [code | lbl_pred | (pad)].
    out_ref[...] = jax.nn.sigmoid(
        h + jnp.dot(s, wc_code, preferred_element_type=jnp.float32))


# ---------------------------------------------------------------------------
# Host-side parameter packing (done ONCE, reused across forward calls)
# ---------------------------------------------------------------------------
def pack_params(params, length_of_data, label_dim, *,
                stream_dtype=jnp.float32, pad_lanes=None):
    """Pack (w1,b1,w2,b2,wc,bc) into one zero-padded slab.

    Returns a dict with the slab and the static offsets the kernel needs.
    stream_dtype: dtype used to stream x and the slab from HBM (bf16 halves
      the dominant HBM traffic; dots still accumulate in f32).
    pad_lanes: pad output/slab lane dim to 128 (lane-dense stores). Auto-on
      for large feature counts where the input stream dominates.
    """
    d_mrna = length_of_data['mRNATPM']
    d_mirna = length_of_data['miRNA']
    d_cnv = length_of_data['cnv']
    d_clin = length_of_data['clinical']
    d_total = d_mrna + d_mirna + d_cnv + d_clin
    C = CODE_DIM + label_dim
    if pad_lanes is None:
        pad_lanes = d_total >= 256
    c_pad = _round_up(C, _LANE) if pad_lanes else C

    w1, b1 = params['w1'], params['b1']
    w2, b2 = params['w2'], params['b2']
    wc, bc = params['wc'], params['bc']

    # Row offsets aligned to 16 so both f32 (8) and bf16 (16) sublane tilings
    # see aligned static slices.
    r1 = _round_up(d_total, 16)
    r2 = _round_up(r1 + c_pad, 16)
    rows = _round_up(r2 + 1, 16)

    slab = jnp.zeros((rows, c_pad), jnp.float32)
    # W_big: one dot over full x reproduces both encoders and the x_rest part
    # of the classifier (zero rows/cols contribute exact zeros).
    slab = slab.at[0:d_mrna, 0:HIDDEN1].set(w1)
    slab = slab.at[d_mrna:d_mrna + d_mirna, HIDDEN1:CODE_DIM].set(w2)
    slab = slab.at[d_mrna + d_mirna:d_total, CODE_DIM:C].set(wc[CODE_DIM:, :])
    # Wc_code: classifier rows consuming code1/code2, padded so that
    # sigmoid(h) @ Wc_code lands only in the label lanes.
    slab = slab.at[r1:r1 + CODE_DIM, CODE_DIM:C].set(wc[0:CODE_DIM, :])
    # bias row: [b1 | b2 | bc | 0...]
    slab = slab.at[r2, 0:HIDDEN1].set(b1[0])
    slab = slab.at[r2, HIDDEN1:CODE_DIM].set(b2[0])
    slab = slab.at[r2, CODE_DIM:C].set(bc[0])

    slab = slab.astype(stream_dtype)
    return dict(slab=slab, r1=r1, r2=r2, d_total=d_total, c=C, c_pad=c_pad)


# ---------------------------------------------------------------------------
# Batch-tile derivation from the VMEM budget
# ---------------------------------------------------------------------------
def _derive_batch_tile(d_total, c_pad, x_itemsize, slab_bytes,
                       work_budget=_VMEM_WORK_BUDGET):
    # Per-row cost: double-buffered x tile + double-buffered out tile.
    d_pad = _round_up(d_total, _LANE)
    per_row = 2 * d_pad * x_itemsize + 2 * c_pad * 4
    avail = max(work_budget - slab_bytes, per_row * 128)
    tm = int(avail // per_row)
    tm = max(128, min(_MAX_BATCH_TILE, (tm // 128) * 128))
    # TODO(synk): for gigantic feature counts (slab alone > ~24 MiB) raise
    # _VMEM_LIMIT / shrink further instead of relying on the 128-row floor.
    return tm


# ---------------------------------------------------------------------------
# Forward wrappers
# ---------------------------------------------------------------------------
def salmon_forward_packed(x, packed, *, batch_tile=None):
    """Pallas-backed SALMON.forward using a pre-packed parameter slab.

    Returns (x_d, code, lbl_pred) like the PyTorch module (x_d is None).
    """
    slab = packed['slab']
    d_total = packed['d_total']
    r1, r2 = packed['r1'], packed['r2']
    C, c_pad = packed['c'], packed['c_pad']

    B = x.shape[0]
    assert x.shape[1] == d_total, "feature dim mismatch with length_of_data"
    if x.dtype != slab.dtype:
        x = x.astype(slab.dtype)   # stream x at the slab's (possibly bf16) dtype

    kernel = functools.partial(_salmon_kernel, d_total=d_total, r1=r1, r2=r2)
    x_bytes = x.dtype.itemsize
    slab_bytes = slab.size * slab.dtype.itemsize
    cost = pl.CostEstimate(
        flops=2 * B * d_total * c_pad + 2 * B * c_pad * c_pad,
        transcendentals=2 * B * c_pad,
        bytes_accessed=int(x.size * x_bytes + slab_bytes + B * c_pad * 4),
    )

    vmem_spec = pl.BlockSpec(memory_space=pltpu.MemorySpace.VMEM)

    if B <= _GRIDLESS_MAX_BATCH:
        # Gridless single-tile call: whole problem resident in VMEM, no
        # pipeline prologue/epilogue, 2 input DMAs + 1 output DMA total.
        out = pl.pallas_call(
            kernel,
            out_shape=jax.ShapeDtypeStruct((B, c_pad), jnp.float32),
            in_specs=[vmem_spec, vmem_spec],
            out_specs=vmem_spec,
            compiler_params=pltpu.CompilerParams(vmem_limit_bytes=_VMEM_LIMIT),
            cost_estimate=cost,
        )(x, slab)
    else:
        # Batch-tiled grid: x / out row-blocked ("parallel" -> megacore
        # sharding on v7x); the parameter slab is a whole-array VMEM operand,
        # so it is copied once and never double-buffered.
        tm = batch_tile if batch_tile is not None else _derive_batch_tile(
            d_total, c_pad, x_bytes, slab_bytes)
        # Guarantee >= 2 tiles so both TensorCores get work on v7x.
        tm = min(tm, _round_up(pl.cdiv(B, 2), 128))
        tm = _round_up(max(tm, 128), 128)
        grid = (pl.cdiv(B, tm),)   # ragged tail handled by Pallas edge clipping
        out = pl.pallas_call(
            kernel,
            out_shape=jax.ShapeDtypeStruct((B, c_pad), jnp.float32),
            grid=grid,
            in_specs=[
                pl.BlockSpec((tm, d_total), lambda i: (i, 0)),
                vmem_spec,   # constant slab, VMEM-resident, single copy
            ],
            out_specs=pl.BlockSpec((tm, c_pad), lambda i: (i, 0)),
            compiler_params=pltpu.CompilerParams(
                dimension_semantics=("parallel",),
                vmem_limit_bytes=_VMEM_LIMIT),
            cost_estimate=cost,
        )(x, slab)

    x_d = None
    code = out[:, :CODE_DIM]
    lbl_pred = out[:, CODE_DIM:C]
    return x_d, code, lbl_pred


def build_salmon_forward(params, length_of_data, label_dim, *,
                         stream_dtype=jnp.float32, pad_lanes=None,
                         batch_tile=None):
    """Pack parameters ONCE and return a reusable forward(x) closure."""
    packed = pack_params(params, length_of_data, label_dim,
                         stream_dtype=stream_dtype, pad_lanes=pad_lanes)

    def forward(x):
        return salmon_forward_packed(x, packed, batch_tile=batch_tile)

    return forward


def salmon_forward(x, params, length_of_data, label_dim, **kwargs):
    """One-shot convenience wrapper (packs every call; prefer build_salmon_forward)."""
    packed = pack_params(params, length_of_data, label_dim,
                         stream_dtype=kwargs.pop('stream_dtype', jnp.float32),
                         pad_lanes=kwargs.pop('pad_lanes', None))
    return salmon_forward_packed(x, packed, **kwargs)


# ---------------------------------------------------------------------------
# Init / reference (for the correctness check)
# ---------------------------------------------------------------------------
def init_params(key, length_of_data, label_dim):
    """Deterministic init mimicking nn.Linear's U(-1/sqrt(fan_in), 1/sqrt(fan_in))."""
    d_mrna = length_of_data['mRNATPM']
    d_mirna = length_of_data['miRNA']
    d_cls = CODE_DIM + length_of_data['cnv'] + length_of_data['clinical']

    ks = jax.random.split(key, 6)

    def uni(k, shape, fan_in):
        bound = 1.0 / jnp.sqrt(jnp.float32(fan_in))
        return jax.random.uniform(k, shape, jnp.float32, -bound, bound)

    return {
        'w1': uni(ks[0], (d_mrna, HIDDEN1), d_mrna),
        'b1': uni(ks[1], (1, HIDDEN1), d_mrna),
        'w2': uni(ks[2], (d_mirna, HIDDEN2), d_mirna),
        'b2': uni(ks[3], (1, HIDDEN2), d_mirna),
        'wc': uni(ks[4], (d_cls, label_dim), d_cls),
        'bc': uni(ks[5], (1, label_dim), d_cls),
    }


def _reference_forward(x, params, length_of_data):
    """Pure-JAX reference mirroring the PyTorch module."""
    d_mrna = length_of_data['mRNATPM']
    d_mirna = length_of_data['miRNA']
    x1 = x[:, :d_mrna]
    x2 = x[:, d_mrna:d_mrna + d_mirna]
    xr = x[:, d_mrna + d_mirna:]
    code1 = jax.nn.sigmoid(x1 @ params['w1'] + params['b1'])
    code2 = jax.nn.sigmoid(x2 @ params['w2'] + params['b2'])
    cls_in = jnp.concatenate([code1, code2, xr], axis=1)
    lbl = jax.nn.sigmoid(cls_in @ params['wc'] + params['bc'])
    code = jnp.concatenate([code1, code2], axis=1)
    return code, lbl


if __name__ == "__main__":
    length_of_data = {'mRNATPM': 32, 'miRNA': 16, 'cnv': 8, 'clinical': 8}
    label_dim = 4
    d_total = sum(length_of_data.values())

    key = jax.random.PRNGKey(0)
    kx, kp, kx2 = jax.random.split(key, 3)
    params = init_params(kp, length_of_data, label_dim)

    # ---- small batch: gridless single-tile path (packed once via builder) --
    fwd = build_salmon_forward(params, length_of_data, label_dim)
    B = 8
    x = jax.random.normal(kx, (B, d_total), dtype=jnp.float32)
    x_d, code, lbl_pred = fwd(x)
    jax.block_until_ready((code, lbl_pred))

    code_ref, lbl_ref = _reference_forward(x, params, length_of_data)
    assert x_d is None
    assert jnp.allclose(code, code_ref, atol=2e-5), "code mismatch (small batch)"
    assert jnp.allclose(lbl_pred, lbl_ref, atol=2e-5), "lbl_pred mismatch (small batch)"

    # ---- larger, non-multiple-of-tile batch: row-blocked 'parallel' grid ---
    # (exercises ragged-tail edge handling: no host-side pad, no out[:B] slice)
    packed_f32 = pack_params(params, length_of_data, label_dim)
    B2 = 520
    x2 = jax.random.normal(kx2, (B2, d_total), dtype=jnp.float32)
    _, code2, lbl2 = salmon_forward_packed(x2, packed_f32, batch_tile=256)
    jax.block_until_ready((code2, lbl2))

    code2_ref, lbl2_ref = _reference_forward(x2, params, length_of_data)
    assert jnp.allclose(code2, code2_ref, atol=2e-5), "code mismatch (grid path)"
    assert jnp.allclose(lbl2, lbl2_ref, atol=2e-5), "lbl_pred mismatch (grid path)"

    # ---- bandwidth-optimized variant: bf16 streaming + lane-dense output ---
    packed_bf16 = pack_params(params, length_of_data, label_dim,
                              stream_dtype=jnp.bfloat16, pad_lanes=True)
    _, code3, lbl3 = salmon_forward_packed(x2, packed_bf16, batch_tile=256)
    jax.block_until_ready((code3, lbl3))
    assert jnp.allclose(code3, code2_ref, atol=3e-2), "code mismatch (bf16 path)"
    assert jnp.allclose(lbl3, lbl2_ref, atol=3e-2), "lbl_pred mismatch (bf16 path)"

    print("KERNEL_OK")
</pallas_src>

<mosaic_0001>
module attributes {stable_mosaic.version = 11 : i64} {
  func.func @_salmon_kernel(%arg0: memref<8x64xf32, #tpu.memory_space<vmem>>, %arg1: memref<96x16xf32, #tpu.memory_space<vmem>>, %arg2: memref<8x16xf32, #tpu.memory_space<vmem>>) attributes {dimension_semantics = [], scalar_prefetch = 0 : i64, scratch_operands = 0 : i64, tpu.core_type = #tpu.core_type<tc>} {
    %c0 = arith.constant 0 : index
    %c0_0 = arith.constant 0 : index
    %0 = vector.load %arg0[%c0, %c0_0] : memref<8x64xf32, #tpu.memory_space<vmem>>, vector<8x64xf32>
    %c0_1 = arith.constant 0 : index
    %c0_2 = arith.constant 0 : index
    %1 = vector.load %arg1[%c0_1, %c0_2] : memref<96x16xf32, #tpu.memory_space<vmem>>, vector<64x16xf32>
    %c64 = arith.constant 64 : index
    %c0_3 = arith.constant 0 : index
    %2 = vector.load %arg1[%c64, %c0_3] : memref<96x16xf32, #tpu.memory_space<vmem>>, vector<16x16xf32>
    %c80 = arith.constant 80 : index
    %c0_4 = arith.constant 0 : index
    %3 = vector.load %arg1[%c80, %c0_4] : memref<96x16xf32, #tpu.memory_space<vmem>>, vector<1x16xf32>
    %cst = arith.constant dense<0.000000e+00> : vector<8x16xf32>
    %4 = tpu.matmul %0, %1, %cst {dimension_numbers = #tpu.dot_dimension_numbers<[1], [0], [0], [1], [0, 0, 1, 1], [], []>} : vector<8x64xf32>, vector<64x16xf32>, vector<8x16xf32> -> vector<8x16xf32>
    %5 = vector.broadcast %3 : vector<1x16xf32> to vector<8x16xf32>
    %6 = arith.addf %4, %5 : vector<8x16xf32>
    %7 = arith.negf %6 : vector<8x16xf32>
    %8 = math.exp %7 : vector<8x16xf32>
    %cst_5 = arith.constant 1.000000e+00 : f32
    %9 = vector.broadcast %cst_5 : f32 to vector<8x16xf32>
    %10 = arith.addf %9, %8 : vector<8x16xf32>
    %11 = arith.divf %9, %10 : vector<8x16xf32>
    %cst_6 = arith.constant dense<0.000000e+00> : vector<8x16xf32>
    %12 = tpu.matmul %11, %2, %cst_6 {dimension_numbers = #tpu.dot_dimension_numbers<[1], [0], [0], [1], [0, 0, 1, 1], [], []>} : vector<8x16xf32>, vector<16x16xf32>, vector<8x16xf32> -> vector<8x16xf32>
    %13 = arith.addf %6, %12 : vector<8x16xf32>
    %14 = arith.negf %13 : vector<8x16xf32>
    %15 = math.exp %14 : vector<8x16xf32>
    %cst_7 = arith.constant 1.000000e+00 : f32
    %16 = vector.broadcast %cst_7 : f32 to vector<8x16xf32>
    %17 = arith.addf %16, %15 : vector<8x16xf32>
    %18 = arith.divf %16, %17 : vector<8x16xf32>
    %c0_8 = arith.constant 0 : index
    %c0_9 = arith.constant 0 : index
    %19 = vector.load %arg2[%c0_8, %c0_9] : memref<8x16xf32, #tpu.memory_space<vmem>>, vector<8x16xf32>
    tpu.vector_store %arg2[%c0_8, %c0_9], %18 {strides = array<i32>} : memref<8x16xf32, #tpu.memory_space<vmem>>, vector<8x16xf32>,
    return
  }
}

</mosaic_0001>

<bundles_post_ra>
// kernel: tpu_custom_call.1
= control target key start
LH: loop header
LB: loop body
LE: loop exit
PB: predicated region body
PF: predicated region fallthrough
CT: control target
= control target key end

     0   :  { %v280_v1 = vmov 0.0   ;;  %vm281_vm0 = vmmov 0   ;;  %s337_s0 = inlined_call_operand.vmem [shape: f32[8,64], index: 0, kind: input, shape index: {}]   ;;  %s338_s1 = inlined_call_operand.vmem [shape: f32[96,16], index: 1, kind: input, shape index: {}]   ;;  %s339_s2 = inlined_call_operand.hbm [shape: f32[8,16], index: 2, kind: output, shape index: {}]  }
   0x1   :  { %v20_v0 = vld [vmem:[%s338_s1 + $0x38] sm:$0xff]  ;;  %221 = vmatprep.subr.mxu0 %v280_v1  ;;  %v19_v2 = vld [vmem:[%s338_s1 + $0x30] sm:$0xff]  ;;  %237 = vmatprep.mubr.msk.f32.mxu0 %vm281_vm0, %v280_v1  ;;  %v18_v3 = vld [vmem:[%s338_s1 + $0x28] sm:$0xff] }
   0x2   :  { %222 = vmatpush3.msra.mxu0 %v20_v0  ;;  %240 = vmatprep.subr.mxu1 %v280_v1 }
   0x3   :  { %223 = vmatprep.subr.mxu0 %v280_v1  ;;  %244 = vmatprep.mubr.msk.f32.mxu1 %vm281_vm0, %v280_v1 }
   0x4   :  { %7 = vsyncpa [#allocation3], 0  ;;  %224 = vmatpush3.msra.mxu0 %v19_v2  ;;  %v17_v4 = vld [vmem:[%s338_s1 + $0x20] sm:$0xff]  ;;  %v16_v5 = vld [vmem:[%s338_s1 + $0x18] sm:$0xff]  ;;  %vm28_vm1 = vcmask 523264   ;;  %vm108_vm2 = vcmask 130048  }
   0x5   :  { %225 = vmatprep.subr.mxu0 %v280_v1  ;;  %v15_v6 = vld [vmem:[%s338_s1 + $0x10] sm:$0xff]  ;;  %v14_v7 = vld [vmem:[%s338_s1 + $0x8] sm:$0xff]  ;;  %v13_v8 = vld [vmem:[%s338_s1] sm:$0xff] }
   0x6   :  { %226 = vmatpush3.msra.mxu0 %v18_v3  ;;  %v12_v9 = vld [vmem:[%s337_s0] sm:$0xff]  ;;  %v22_v10 = vld [vmem:[%s338_s1 + $0x48] sm:$0xff]  ;;  %v204_v12 = vld [vmem:[%s338_s1 + $0x50] ss:$0 sm:$0xff]  ;;  %s282_s0 = smov [#allocation2]  }
   0x7   :  { %227 = vmatprep.subr.mxu0 %v280_v1  ;;  %v21_v11 = vld [vmem:[%s338_s1 + $0x40] sm:$0xff]  ;;  %241 = vmatpush3.msra.mxu1 %v22_v10  ;;  %s196_s1 = sshll.u32 %s282_s0, 4  ;;  %s197_s1 = int_to_ptr.vmem [resolvable:$true] %s196_s1 }
   0x8   :  { %228 = vmatpush3.msra.mxu0 %v17_v4  ;;  %242 = vmatprep.subr.mxu1 %v280_v1  ;;  %s258_s5 = scalar_lea.vmem %s197_s1, 128  ;;  %p263_p1 = scmp.lt.s32.totalorder %s197_s1, %s197_s1 }
   0x9   :  { %229 = vmatprep.subr.mxu0 %v280_v1  ;;  %243 = vmatpush3.msra.mxu1 %v21_v11  ;;  %p259_p0 = scmp.ne.s32.totalorder %s197_s1, %s258_s5  ;;  %p264_p2 = scmp.lt.s32.totalorder %s258_s5, %s258_s5 }
   0xa   :  { %230 = vmatpush3.msra.mxu0 %v16_v5 }
   0xb   :  { %231 = vmatprep.subr.mxu0 %v280_v1  ;;  %p265_p3 = por %p264_p2, %p263_p1 }
   0xc   :  { %232 = vmatpush3.msra.mxu0 %v15_v6 }
   0xd   :  { %233 = vmatprep.subr.mxu0 %v280_v1  ;;  %p266_p4 = pnand %p265_p3, %p259_p0 }
   0xe   :  { %234 = vmatpush3.msra.mxu0 %v14_v7 }
   0xf   :  { %235 = vmatprep.subr.mxu0 %v280_v1 }
  0x10   :  { %236 = vmatpush3.msra.mxu0 %v13_v8 }
  0x11   :  { %238 = vmatmul.mubr.msk.f32.vlgmr.msra.gmra.mxu0 %vm28_vm1, %v12_v9 }
  0xd1   :  { %v98_v13 = vpop.f32.mrf.mxu0 }
  0xd2   :  { %v99_v14 = vadd.f32 %v204_v12, %v98_v13 }
  0xd3   :  { %v239_v15 = vpop.f32.mrf.mxu0 }
  0xd4   :  { %v206_v16 = vmul.f32 -1.442695, %v99_v14 }
  0xd6   :  { %250 = vpow2.f32 %v206_v16 }
  0xe3   :  { %v251_v17 = vpop.eup %250 }
  0xe4   :  { %v105_v18 = vadd.f32 1.0, %v251_v17 }
  0xe6   :  { %252 = vrcp.f32 %v105_v18 }
  0xf3   :  { %v253_v19 = vpop.eup %252 }
  0xf4   :  { %245 = vmatmul.mubr.msk.f32.vlgmr.msra.gmra.mxu1 %vm108_vm2, %v253_v19 }
 0x1b4   :  { %v178_v20 = vpop.f32.mrf.mxu1 }
 0x1b5   :  { %v182_v21 = vadd.f32 %v178_v20, %v99_v14 }
 0x1b6   :  { %v246_v22 = vpop.f32.mrf.mxu1 }
 0x1b7   :  { %v208_v23 = vmul.f32 -1.442695, %v182_v21 }
 0x1b9   :  { %254 = vpow2.f32 %v208_v23 }
 0x1c6   :  { %v255_v24 = vpop.eup %254 }
 0x1c7   :  { %v186_v25 = vadd.f32 1.0, %v255_v24 }
 0x1c9   :  { %256 = vrcp.f32 %v186_v25 }
 0x1d6   :  { %v257_v26 = vpop.eup %256 }
 0x1d7   :  { %189 = vst.msk [vmem:[#allocation2] sm:$0xff] %vm108_vm2, %v257_v26 }
 0x1d8   :  { %269 = shalt.err (!%p266_p4)
}
 0x1d9   :  { %199 = dma.vmem_to_hbm [thread:$0]  %s197_s1, 128, %s339_s2, [#allocation3]  }
 0x1da   :  { %278 = dma.done.wait [#allocation3], 128  }
 0x1db   :  { %279 = vsyncadd [#allocation3], 4294967168 }
 0x1dc   :  { %203 = vsyncpa [#allocation3], 1 }

</bundles_post_ra>
